<compile_context>
chip_gen: v6e
topology: v6e:2x2x1
jax: 0.10.0
libtpu: 0.0.40
codegen_flags: <defaults>
</compile_context>

<pallas_src>
import functools

import jax
import jax.numpy as jnp
from jax.experimental import pallas as pl
from jax.experimental.pallas import tpu as pltpu


def _round_up(n, m):
    return ((n + m - 1) // m) * m


def cnn_kernel(x_ref, w1_ref, b1_ref, w2_ref, b2_ref,
               wfc1_ref, bfc1_ref, wfc2_ref, bfc2_ref, out_ref, *, d1p):
    x = x_ref[...]                                              # (TB, L) bf16

    # conv1 (1->16, k=3) + ReLU + max_pool1d(k=2):
    # one merged bf16 matmul over [even taps | odd taps], then a lane-halved
    # max + shared bias + ReLU on the f32 accumulator.
    h = jnp.dot(x, w1_ref[...], preferred_element_type=jnp.float32)  # (TB, 2*D1p)
    h1p = jnp.maximum(jnp.maximum(h[:, :d1p], h[:, d1p:]) + b1_ref[...], 0.0)

    # conv2 (16->32, k=3) + ReLU as one dense banded matmul (bf16 in, f32 acc)
    h2 = jnp.maximum(
        jnp.dot(h1p.astype(jnp.bfloat16), w2_ref[...],
                preferred_element_type=jnp.float32) + b2_ref[...], 0.0)

    # fc1 (32*T2 -> 128) + ReLU, single fused matmul
    y1 = jnp.maximum(
        jnp.dot(h2.astype(jnp.bfloat16), wfc1_ref[...],
                preferred_element_type=jnp.float32) + bfc1_ref[...], 0.0)

    # fc2 (128 -> num_classes padded to 128 lanes) — lane-dense f32 store
    out_ref[...] = (jnp.dot(y1.astype(jnp.bfloat16), wfc2_ref[...],
                            preferred_element_type=jnp.float32)
                    + bfc2_ref[...])


def pack_params(params, input_size, num_classes):
    """One-time weight packing (hoisted out of the per-call forward path).

    Builds dense, lane-padded bf16 matmul operands that reproduce PyTorch's
    NCL conv / pool / flatten semantics via matrix structure.
    """
    L = input_size
    assert L % 2 == 0, "even input_size assumed"
    T1 = L - 2
    P = T1 // 2
    T2 = P - 2
    C1, C2, H = 16, 32, 128

    w1_t, b1, w2_t, b2, wfc1, bfc1, wfc2, bfc2 = params
    dt = jnp.float32

    D1, D2 = P * C1, T2 * C2
    D1p, D2p = _round_up(D1, 128), _round_up(D2, 128)
    NCp = _round_up(num_classes, 128)

    # conv1: h_even[b,p,c] = sum_k w1[c,k] * x[b, 2p+k];  h_odd uses 2p+1+k.
    w1 = w1_t[:, 0, :].astype(dt)                               # (16, 3) [c,k]
    p_idx = jnp.arange(P)
    W1e4 = jnp.zeros((L, P, C1), dt)
    W1o4 = jnp.zeros((L, P, C1), dt)
    for k in range(3):
        vals = jnp.broadcast_to(w1[:, k][None, :], (P, C1))
        W1e4 = W1e4.at[2 * p_idx + k, p_idx, :].set(vals)
        W1o4 = W1o4.at[2 * p_idx + k + 1, p_idx, :].set(vals)
    W1e = jnp.pad(W1e4.reshape(L, D1), ((0, 0), (0, D1p - D1)))
    W1o = jnp.pad(W1o4.reshape(L, D1), ((0, 0), (0, D1p - D1)))
    W1cat = jnp.concatenate([W1e, W1o], axis=1)                 # (L, 2*D1p)
    b1k = jnp.pad(jnp.tile(b1.astype(dt), P), (0, D1p - D1)).reshape(1, D1p)

    # conv2 as a dense banded matrix: W2[(t+k)*16+ci, t*32+c] = w2[c,ci,k]
    # TODO(synk): for large input_size replace this dense O(L^2) banded matrix
    # with a time-tiled block-banded formulation (or 3 shifted matmuls via
    # pltpu.roll); at L=32 the structural-zero waste is minor.
    t_idx = jnp.arange(T2)
    W24 = jnp.zeros((P, C1, T2, C2), dt)
    for k in range(3):
        vals = jnp.broadcast_to(
            jnp.transpose(w2_t[:, :, k]).astype(dt)[None], (T2, C1, C2))
        W24 = W24.at[t_idx + k, :, t_idx, :].set(vals)
    W2 = jnp.pad(W24.reshape(D1, D2), ((0, D1p - D1), (0, D2p - D2)))
    b2k = jnp.pad(jnp.tile(b2.astype(dt), T2), (0, D2p - D2)).reshape(1, D2p)

    # fc1: torch flatten order is c*T2 + t, our h2 lane order is t*32 + c.
    Wfc1 = jnp.pad(
        jnp.transpose(wfc1.astype(dt).reshape(H, C2, T2), (2, 1, 0)).reshape(D2, H),
        ((0, D2p - D2), (0, 0)))
    bfc1k = bfc1.astype(dt).reshape(1, H)

    # fc2 padded to 128 output lanes for dense stores.
    Wfc2 = jnp.pad(jnp.transpose(wfc2.astype(dt)),
                   ((0, 0), (0, NCp - num_classes)))
    bfc2k = jnp.pad(bfc2.astype(dt), (0, NCp - num_classes)).reshape(1, NCp)

    bf = jnp.bfloat16
    return dict(
        L=L, D1p=D1p, D2p=D2p, H=H, NCp=NCp, num_classes=num_classes,
        W1=W1cat.astype(bf), b1=b1k,
        W2=W2.astype(bf), b2=b2k,
        Wfc1=Wfc1.astype(bf), bfc1=bfc1k,
        Wfc2=Wfc2.astype(bf), bfc2=bfc2k,
    )


def cnn_forward(x, packed):
    """x: (B, 1, L) float32 (PyTorch NCL). Returns (B, num_classes) float32."""
    B = x.shape[0]
    L, D1p, D2p = packed["L"], packed["D1p"], packed["D2p"]
    H, NCp, num_classes = packed["H"], packed["NCp"], packed["num_classes"]

    # ---- batch blocking ------------------------------------------------------
    # Big tiles amortize per-grid-step overhead; when the batch allows it,
    # guarantee >= 2 grid steps so both v7x TensorCores get work.
    B8 = _round_up(B, 8)
    if B8 <= 8:
        TB = 8
    else:
        TB = min(512, _round_up((B8 + 1) // 2, 8))
    B_pad = _round_up(B, TB)

    xk = jnp.pad(x[:, 0, :].astype(jnp.float32),
                 ((0, B_pad - B), (0, 0))).astype(jnp.bfloat16)  # (B_pad, L)

    def wspec(arr):
        nd = arr.ndim
        return pl.BlockSpec(arr.shape, lambda i, _nd=nd: (0,) * _nd)

    flops = 2 * B_pad * (L * 2 * D1p + D1p * D2p + D2p * H + H * NCp)
    bytes_accessed = (2 * B_pad * L + 4 * B_pad * NCp
                      + 2 * (L * 2 * D1p + D1p * D2p + D2p * H + H * NCp)
                      + 4 * (D1p + D2p + H + NCp))
    cost = pl.CostEstimate(flops=flops, transcendentals=0,
                           bytes_accessed=bytes_accessed)

    kernel = functools.partial(cnn_kernel, d1p=D1p)

    out = pl.pallas_call(
        kernel,
        out_shape=jax.ShapeDtypeStruct((B_pad, NCp), jnp.float32),
        grid=(B_pad // TB,),
        in_specs=[
            pl.BlockSpec((TB, L), lambda i: (i, 0)),
            wspec(packed["W1"]), wspec(packed["b1"]),
            wspec(packed["W2"]), wspec(packed["b2"]),
            wspec(packed["Wfc1"]), wspec(packed["bfc1"]),
            wspec(packed["Wfc2"]), wspec(packed["bfc2"]),
        ],
        out_specs=pl.BlockSpec((TB, NCp), lambda i: (i, 0)),
        compiler_params=pltpu.CompilerParams(
            dimension_semantics=("parallel",),
            vmem_limit_bytes=32 * 1024 * 1024),
        cost_estimate=cost,
    )(xk, packed["W1"], packed["b1"], packed["W2"], packed["b2"],
      packed["Wfc1"], packed["bfc1"], packed["Wfc2"], packed["bfc2"])

    return out[:B, :num_classes]


def reference(x, params):
    """Pure-JAX f32 reference following PyTorch NCL semantics exactly."""
    w1_t, b1, w2_t, b2, wfc1, bfc1, wfc2, bfc2 = params
    B, _, L = x.shape
    T1 = L - 2
    h1 = b1[None, :, None] + sum(
        w1_t[:, 0, k][None, :, None] * x[:, :, k:k + T1] for k in range(3))
    h1 = jnp.maximum(h1, 0.0)
    P = T1 // 2
    h1p = h1[:, :, :2 * P].reshape(B, 16, P, 2).max(axis=-1)
    T2 = P - 2
    h2 = b2[None, :, None] + sum(
        jnp.einsum('oi,bit->bot', w2_t[:, :, k], h1p[:, :, k:k + T2])
        for k in range(3))
    h2 = jnp.maximum(h2, 0.0)
    flat = h2.reshape(B, -1)                       # torch flatten: c*T2 + t
    y = jnp.maximum(flat @ wfc1.T + bfc1, 0.0)
    return y @ wfc2.T + bfc2


if __name__ == "__main__":
    input_size = 32
    num_classes = 10
    batch = 4
    T2 = (input_size - 2) // 2 - 2                 # 13

    key = jax.random.PRNGKey(0)
    ks = jax.random.split(key, 9)

    def uinit(k, shape, fan_in):
        bound = 1.0 / (fan_in ** 0.5)
        return jax.random.uniform(k, shape, jnp.float32, -bound, bound)

    params = (
        uinit(ks[0], (16, 1, 3), 3),               # conv1.weight (O, I, K)
        uinit(ks[1], (16,), 3),                    # conv1.bias
        uinit(ks[2], (32, 16, 3), 16 * 3),         # conv2.weight
        uinit(ks[3], (32,), 16 * 3),               # conv2.bias
        uinit(ks[4], (128, 32 * T2), 32 * T2),     # fc1.weight
        uinit(ks[5], (128,), 32 * T2),             # fc1.bias
        uinit(ks[6], (num_classes, 128), 128),     # fc2.weight
        uinit(ks[7], (num_classes,), 128),         # fc2.bias
    )

    x = jax.random.normal(ks[8], (batch, 1, input_size), jnp.float32)

    packed = pack_params(params, input_size, num_classes)   # one-time packing
    out = jax.block_until_ready(cnn_forward(x, packed))
    ref = reference(x, params)
    assert out.shape == (batch, num_classes)
    # Tolerance loosened vs the f32 version: matmul operands are bf16
    # (accumulation stays f32), so inputs/weights are rounded to ~2^-8.
    assert jnp.allclose(out, ref, atol=5e-2, rtol=5e-2), (
        "max abs err = %g" % float(jnp.max(jnp.abs(out - ref))))
    print("KERNEL_OK")
</pallas_src>

<mosaic_0001>
module attributes {stable_mosaic.version = 11 : i64} {
  func.func @cnn_kernel(%arg0: i32, %arg1: memref<8x32xbf16, #tpu.memory_space<vmem>>, %arg2: memref<32x512xbf16, #tpu.memory_space<vmem>>, %arg3: memref<1x256xf32, #tpu.memory_space<vmem>>, %arg4: memref<256x512xbf16, #tpu.memory_space<vmem>>, %arg5: memref<1x512xf32, #tpu.memory_space<vmem>>, %arg6: memref<512x128xbf16, #tpu.memory_space<vmem>>, %arg7: memref<1x128xf32, #tpu.memory_space<vmem>>, %arg8: memref<128x128xbf16, #tpu.memory_space<vmem>>, %arg9: memref<1x128xf32, #tpu.memory_space<vmem>>, %arg10: memref<8x128xf32, #tpu.memory_space<vmem>>) attributes {dimension_semantics = [#tpu.dimension_semantics<parallel>], iteration_bounds = array<i64: 1>, scalar_prefetch = 0 : i64, scratch_operands = 0 : i64, tpu.core_type = #tpu.core_type<tc>, window_params = [{transform_indices = @transform_0, window_bounds = array<i64: 8, 32>}, {pipeline_mode = #tpu.pipeline_mode<synchronous>, transform_indices = @transform_1, window_bounds = array<i64: 32, 512>}, {pipeline_mode = #tpu.pipeline_mode<synchronous>, transform_indices = @transform_2, window_bounds = array<i64: 1, 256>}, {pipeline_mode = #tpu.pipeline_mode<synchronous>, transform_indices = @transform_3, window_bounds = array<i64: 256, 512>}, {pipeline_mode = #tpu.pipeline_mode<synchronous>, transform_indices = @transform_4, window_bounds = array<i64: 1, 512>}, {pipeline_mode = #tpu.pipeline_mode<synchronous>, transform_indices = @transform_5, window_bounds = array<i64: 512, 128>}, {pipeline_mode = #tpu.pipeline_mode<synchronous>, transform_indices = @transform_6, window_bounds = array<i64: 1, 128>}, {pipeline_mode = #tpu.pipeline_mode<synchronous>, transform_indices = @transform_7, window_bounds = array<i64: 128, 128>}, {pipeline_mode = #tpu.pipeline_mode<synchronous>, transform_indices = @transform_8, window_bounds = array<i64: 1, 128>}, {transform_indices = @transform_9, window_bounds = array<i64: 8, 128>}]} {
    %c0 = arith.constant 0 : index
    %c0_0 = arith.constant 0 : index
    %0 = vector.load %arg1[%c0, %c0_0] : memref<8x32xbf16, #tpu.memory_space<vmem>>, vector<8x32xbf16>
    %c0_1 = arith.constant 0 : index
    %c0_2 = arith.constant 0 : index
    %1 = vector.load %arg2[%c0_1, %c0_2] : memref<32x512xbf16, #tpu.memory_space<vmem>>, vector<32x512xbf16>
    %cst = arith.constant dense<0.000000e+00> : vector<8x512xf32>
    %2 = tpu.matmul %0, %1, %cst {dimension_numbers = #tpu.dot_dimension_numbers<[1], [0], [0], [1], [0, 0, 1, 1], [], []>} : vector<8x32xbf16>, vector<32x512xbf16>, vector<8x512xf32> -> vector<8x512xf32>
    %3 = vector.extract_strided_slice %2 {offsets = [0, 0], sizes = [8, 256], strides = [1, 1]} : vector<8x512xf32> to vector<8x256xf32>
    %4 = vector.extract_strided_slice %2 {offsets = [0, 256], sizes = [8, 256], strides = [1, 1]} : vector<8x512xf32> to vector<8x256xf32>
    %5 = arith.maximumf %3, %4 : vector<8x256xf32>
    %c0_3 = arith.constant 0 : index
    %c0_4 = arith.constant 0 : index
    %6 = vector.load %arg3[%c0_3, %c0_4] : memref<1x256xf32, #tpu.memory_space<vmem>>, vector<1x256xf32>
    %7 = vector.broadcast %6 : vector<1x256xf32> to vector<8x256xf32>
    %8 = arith.addf %5, %7 : vector<8x256xf32>
    %cst_5 = arith.constant 0.000000e+00 : f32
    %9 = vector.broadcast %cst_5 : f32 to vector<8x256xf32>
    %10 = arith.maximumf %8, %9 : vector<8x256xf32>
    %11 = arith.truncf %10 : vector<8x256xf32> to vector<8x256xbf16>
    %c0_6 = arith.constant 0 : index
    %c0_7 = arith.constant 0 : index
    %12 = vector.load %arg4[%c0_6, %c0_7] : memref<256x512xbf16, #tpu.memory_space<vmem>>, vector<256x512xbf16>
    %cst_8 = arith.constant dense<0.000000e+00> : vector<8x512xf32>
    %13 = tpu.matmul %11, %12, %cst_8 {dimension_numbers = #tpu.dot_dimension_numbers<[1], [0], [0], [1], [0, 0, 1, 1], [], []>} : vector<8x256xbf16>, vector<256x512xbf16>, vector<8x512xf32> -> vector<8x512xf32>
    %c0_9 = arith.constant 0 : index
    %c0_10 = arith.constant 0 : index
    %14 = vector.load %arg5[%c0_9, %c0_10] : memref<1x512xf32, #tpu.memory_space<vmem>>, vector<1x512xf32>
    %15 = vector.broadcast %14 : vector<1x512xf32> to vector<8x512xf32>
    %16 = arith.addf %13, %15 : vector<8x512xf32>
    %cst_11 = arith.constant 0.000000e+00 : f32
    %17 = vector.broadcast %cst_11 : f32 to vector<8x512xf32>
    %18 = arith.maximumf %16, %17 : vector<8x512xf32>
    %19 = arith.truncf %18 : vector<8x512xf32> to vector<8x512xbf16>
    %c0_12 = arith.constant 0 : index
    %c0_13 = arith.constant 0 : index
    %20 = vector.load %arg6[%c0_12, %c0_13] : memref<512x128xbf16, #tpu.memory_space<vmem>>, vector<512x128xbf16>
    %cst_14 = arith.constant dense<0.000000e+00> : vector<8x128xf32>
    %21 = tpu.matmul %19, %20, %cst_14 {dimension_numbers = #tpu.dot_dimension_numbers<[1], [0], [0], [1], [0, 0, 1, 1], [], []>} : vector<8x512xbf16>, vector<512x128xbf16>, vector<8x128xf32> -> vector<8x128xf32>
    %c0_15 = arith.constant 0 : index
    %c0_16 = arith.constant 0 : index
    %22 = vector.load %arg7[%c0_15, %c0_16] : memref<1x128xf32, #tpu.memory_space<vmem>>, vector<1x128xf32>
    %23 = vector.broadcast %22 : vector<1x128xf32> to vector<8x128xf32>
    %24 = arith.addf %21, %23 : vector<8x128xf32>
    %cst_17 = arith.constant 0.000000e+00 : f32
    %25 = vector.broadcast %cst_17 : f32 to vector<8x128xf32>
    %26 = arith.maximumf %24, %25 : vector<8x128xf32>
    %27 = arith.truncf %26 : vector<8x128xf32> to vector<8x128xbf16>
    %c0_18 = arith.constant 0 : index
    %c0_19 = arith.constant 0 : index
    %28 = vector.load %arg8[%c0_18, %c0_19] : memref<128x128xbf16, #tpu.memory_space<vmem>>, vector<128x128xbf16>
    %cst_20 = arith.constant dense<0.000000e+00> : vector<8x128xf32>
    %29 = tpu.matmul %27, %28, %cst_20 {dimension_numbers = #tpu.dot_dimension_numbers<[1], [0], [0], [1], [0, 0, 1, 1], [], []>} : vector<8x128xbf16>, vector<128x128xbf16>, vector<8x128xf32> -> vector<8x128xf32>
    %c0_21 = arith.constant 0 : index
    %c0_22 = arith.constant 0 : index
    %30 = vector.load %arg9[%c0_21, %c0_22] : memref<1x128xf32, #tpu.memory_space<vmem>>, vector<1x128xf32>
    %31 = vector.broadcast %30 : vector<1x128xf32> to vector<8x128xf32>
    %32 = arith.addf %29, %31 : vector<8x128xf32>
    %c0_23 = arith.constant 0 : index
    %c0_24 = arith.constant 0 : index
    %33 = vector.load %arg10[%c0_23, %c0_24] : memref<8x128xf32, #tpu.memory_space<vmem>>, vector<8x128xf32>
    tpu.vector_store %arg10[%c0_23, %c0_24], %32 {strides = array<i32>} : memref<8x128xf32, #tpu.memory_space<vmem>>, vector<8x128xf32>,
    return
  }
  func.func @transform_0(%arg0: i32) -> (i32, i32) {
    %c0_i32 = arith.constant 0 : i32
    %c0_i32_0 = arith.constant 0 : i32
    return %arg0, %c0_i32 : i32, i32
  }
  func.func @transform_1(%arg0: i32) -> (i32, i32) {
    %c0_i32 = arith.constant 0 : i32
    %c0_i32_0 = arith.constant 0 : i32
    %c0_i32_1 = arith.constant 0 : i32
    return %c0_i32, %c0_i32_0 : i32, i32
  }
  func.func @transform_2(%arg0: i32) -> (i32, i32) {
    %c0_i32 = arith.constant 0 : i32
    %c0_i32_0 = arith.constant 0 : i32
    %c0_i32_1 = arith.constant 0 : i32
    return %c0_i32, %c0_i32_0 : i32, i32
  }
  func.func @transform_3(%arg0: i32) -> (i32, i32) {
    %c0_i32 = arith.constant 0 : i32
    %c0_i32_0 = arith.constant 0 : i32
    %c0_i32_1 = arith.constant 0 : i32
    return %c0_i32, %c0_i32_0 : i32, i32
  }
  func.func @transform_4(%arg0: i32) -> (i32, i32) {
    %c0_i32 = arith.constant 0 : i32
    %c0_i32_0 = arith.constant 0 : i32
    %c0_i32_1 = arith.constant 0 : i32
    return %c0_i32, %c0_i32_0 : i32, i32
  }
  func.func @transform_5(%arg0: i32) -> (i32, i32) {
    %c0_i32 = arith.constant 0 : i32
    %c0_i32_0 = arith.constant 0 : i32
    %c0_i32_1 = arith.constant 0 : i32
    return %c0_i32, %c0_i32_0 : i32, i32
  }
  func.func @transform_6(%arg0: i32) -> (i32, i32) {
    %c0_i32 = arith.constant 0 : i32
    %c0_i32_0 = arith.constant 0 : i32
    %c0_i32_1 = arith.constant 0 : i32
    return %c0_i32, %c0_i32_0 : i32, i32
  }
  func.func @transform_7(%arg0: i32) -> (i32, i32) {
    %c0_i32 = arith.constant 0 : i32
    %c0_i32_0 = arith.constant 0 : i32
    %c0_i32_1 = arith.constant 0 : i32
    return %c0_i32, %c0_i32_0 : i32, i32
  }
  func.func @transform_8(%arg0: i32) -> (i32, i32) {
    %c0_i32 = arith.constant 0 : i32
    %c0_i32_0 = arith.constant 0 : i32
    %c0_i32_1 = arith.constant 0 : i32
    return %c0_i32, %c0_i32_0 : i32, i32
  }
  func.func @transform_9(%arg0: i32) -> (i32, i32) {
    %c0_i32 = arith.constant 0 : i32
    %c0_i32_0 = arith.constant 0 : i32
    return %arg0, %c0_i32 : i32, i32
  }
}

</mosaic_0001>

<bundles_post_ra>
// kernel: tpu_custom_call.1
= control target key start
LH: loop header
LB: loop body
LE: loop exit
PB: predicated region body
PF: predicated region fallthrough
CT: control target
= control target key end

     0   :  { %14 = vsyncpa [#allocation3], 0  ;;  %s1824_s0 = inlined_call_operand.hbm [shape: bf16[8,32], index: 0, kind: input, shape index: {}]   ;;  %s1825_s1 = inlined_call_operand.hbm [shape: bf16[32,512], index: 1, kind: input, shape index: {}]   ;;  %s1826_s2 = inlined_call_operand.vmem [shape: f32[1,256], index: 2, kind: input, shape index: {}]   ;;  %s1827_s3 = inlined_call_operand.hbm [shape: bf16[256,512], index: 3, kind: input, shape index: {}]   ;;  %s1828_s4 = inlined_call_operand.vmem [shape: f32[1,512], index: 4, kind: input, shape index: {}]   ;;  %s1829_s5 = inlined_call_operand.hbm [shape: bf16[512,128], index: 5, kind: input, shape index: {}]   ;;  %s1830_s6 = inlined_call_operand.vmem [shape: f32[1,128], index: 6, kind: input, shape index: {}]   ;;  %s1831_s7 = inlined_call_operand.hbm [shape: bf16[128,128], index: 7, kind: input, shape index: {}]   ;;  %s1832_s8 = inlined_call_operand.vmem [shape: f32[1,128], index: 8, kind: input, shape index: {}]   ;;  %s1833_s9 = inlined_call_operand.hbm [shape: f32[8,128], index: 9, kind: output, shape index: {}]  }
   0x1   :  { %15 = vsyncpa [#allocation6], 0 }
   0x2   :  { %16 = vsyncpa [#allocation9], 0 }
   0x3   :  { %17 = vsyncpa [#allocation4], 0  ;;  %s1703_s30 = smov [#allocation5]  }
   0x4   :  { %s33_s10 = sshll.u32 %s1703_s30, 4  ;;  %s34_s10 = int_to_ptr.vmem [resolvable:$true] %s33_s10 }
   0x5   :  { %s1583_s11 = scalar_lea.vmem %s34_s10, 1024  ;;  %p1588_p1 = scmp.lt.s32.totalorder %s34_s10, %s34_s10 }
   0x6   :  { %p1584_p0 = scmp.ne.s32.totalorder %s34_s10, %s1583_s11  ;;  %p1589_p2 = scmp.lt.s32.totalorder %s1583_s11, %s1583_s11 }
   0x8   :  { %p1590_p3 = por %p1589_p2, %p1588_p1 }
   0xa   :  { %p1591_p4 = pnand %p1590_p3, %p1584_p0 }
   0xc   :  { %1594 = shalt.err (!%p1591_p4)
}
   0xd   :  { %s1704_s12 = smov 256   ;;  %s1705_s13 = smov 16  }
   0xe   :  { %39 = dma.hbm_to_vmem [thread:$0]  %s1825_s1, 1024, %s34_s10, [#allocation6], %s1704_s12, %s1704_s12, %s1705_s13  }
   0xf   :  { %s1706_s16 = smov [#allocation8]  }
  0x10   :  { %s61_s17 = sshll.u32 %s1706_s16, 4  ;;  %s62_s17 = int_to_ptr.vmem [resolvable:$true] %s61_s17 }
  0x11   :  { %s1603_s18 = scalar_lea.vmem %s62_s17, 4096  ;;  %p1608_p6 = scmp.lt.s32.totalorder %s62_s17, %s62_s17 }
  0x12   :  { %p1604_p5 = scmp.ne.s32.totalorder %s62_s17, %s1603_s18  ;;  %p1609_p7 = scmp.lt.s32.totalorder %s1603_s18, %s1603_s18 }
  0x14   :  { %p1610_p8 = por %p1609_p7, %p1608_p6 }
  0x16   :  { %p1611_p9 = pnand %p1610_p8, %p1604_p5 }
  0x18   :  { %1614 = shalt.err (!%p1611_p9)
}
  0x19   :  { %s1707_s19 = smov 64   ;;  %s1708_s20 = smov 4  }
  0x1a   :  { %67 = dma.hbm_to_vmem [thread:$0]  %s1829_s5, 4096, %s62_s17, [#allocation9], %s1707_s19, %s1707_s19, %s1708_s20  }
  0x1b   :  { %s1709_s1 = smov [#allocation2]   ;;  %s1710_s24 = smov [#allocation7]  }
  0x1c   :  { %s24_s23 = sshll.u32 %s1709_s1, 4  ;;  %s47_s25 = sshll.u32 %s1710_s24, 4  ;;  %s25_s23 = int_to_ptr.vmem [resolvable:$true] %s24_s23  ;;  %s48_s25 = int_to_ptr.vmem [resolvable:$true] %s47_s25 }
  0x1d   :  { %s1623_s26 = scalar_lea.vmem %s25_s23, 64  ;;  %p1628_p11 = scmp.lt.s32.totalorder %s25_s23, %s25_s23 }
  0x1e   :  { %p1624_p10 = scmp.ne.s32.totalorder %s25_s23, %s1623_s26  ;;  %p1629_p12 = scmp.lt.s32.totalorder %s1623_s26, %s1623_s26 }
  0x20   :  { %p1630_p13 = por %p1629_p12, %p1628_p11 }
  0x22   :  { %p1631_p0 = pnand %p1630_p13, %p1624_p10 }
  0x24   :  { %1634 = shalt.err (!%p1631_p0)
}
  0x25   :  { %27 = dma.hbm_to_vmem [thread:$0]  %s1824_s0, 64, %s25_s23, [#allocation3]  }
  0x26   :  { %s1643_s29 = scalar_lea.vmem %s48_s25, 8192  ;;  %p1648_p2 = scmp.lt.s32.totalorder %s48_s25, %s48_s25 }
  0x27   :  { %p1644_p1 = scmp.ne.s32.totalorder %s48_s25, %s1643_s29  ;;  %p1649_p3 = scmp.lt.s32.totalorder %s1643_s29, %s1643_s29 }
  0x29   :  { %p1650_p4 = por %p1649_p3, %p1648_p2 }
  0x2b   :  { %p1651_p5 = pnand %p1650_p4, %p1644_p1 }
  0x2d   :  { %1654 = shalt.err (!%p1651_p5)
}
  0x2e   :  { %53 = dma.hbm_to_vmem [thread:$0]  %s1827_s3, 8192, %s48_s25, [#allocation6], %s1704_s12, %s1704_s12, %s1705_s13  }
  0x2f   :  { %s1711_s10 = smov [#allocation10]  }
  0x30   :  { %s75_s11 = sshll.u32 %s1711_s10, 4  ;;  %s76_s11 = int_to_ptr.vmem [resolvable:$true] %s75_s11 }
  0x31   :  { %s1663_s14 = scalar_lea.vmem %s76_s11, 1024  ;;  %p1668_p7 = scmp.lt.s32.totalorder %s76_s11, %s76_s11 }
  0x32   :  { %p1664_p6 = scmp.ne.s32.totalorder %s76_s11, %s1663_s14  ;;  %p1669_p8 = scmp.lt.s32.totalorder %s1663_s14, %s1663_s14 }
  0x34   :  { %p1670_p9 = por %p1669_p8, %p1668_p7 }
  0x36   :  { %p1671_p10 = pnand %p1670_p9, %p1664_p6 }
  0x38   :  { %1674 = shalt.err (!%p1671_p10)
}
  0x39   :  { %81 = dma.hbm_to_vmem [thread:$0]  %s1831_s7, 1024, %s76_s11, [#allocation9], %s1707_s19, %s1707_s19, %s1708_s20  }
  0x3a   :  { %1695 = dma.done.wait [#allocation3], 64  }
  0x3b   :  { %1696 = vsyncadd [#allocation3], 4294967232 }
  0x3c   :  { %1697 = dma.done.wait [#allocation6], 9216  }
  0x3d   :  { %1698 = vsyncadd [#allocation6], 4294958080 }
  0x3e   :  { %1699 = dma.done.wait [#allocation9], 5120  }
  0x3f   :  { %1700 = vsyncadd [#allocation9], 4294962176  ;;  %v1712_v0 = vmov 0   ;;  %v1427_v1 = vld [vmem:[#allocation5 + $0x24] ss:$16 sps:$4 sm:$0xff]   ;;  %vm149_vm0 = vcmask 261120  }
  0x40   :  { %185 = vmatprep.mubr.bf16.mxu1 %v1712_v0  ;;  %v1429_v2 = vld [vmem:[#allocation5 + $0x20] ss:$16 sps:$4 sm:$0xff]   ;;  %165 = vmatprep.subr.bf16.mxu1 %v1427_v1  ;;  %v1430_v3 = vld [vmem:[#allocation5 + $0x4] ss:$16 sps:$4 sm:$0xff]   ;;  %v1435_v5 = vld [vmem:[#allocation5 + $0x2c] ss:$16 sps:$4 sm:$0xff]  }
  0x41   :  { %166 = vmatpush1.bf16.msra.mxu1 %v1429_v2  ;;  %v1432_v4 = vld [vmem:[#allocation5] ss:$16 sps:$4 sm:$0xff]   ;;  %v100_v6 = vld [vmem:[#allocation2] sm:$0xf]  ;;  %v1439_v7 = vld [vmem:[#allocation7 + $0xe4] ss:$16 sps:$4 sm:$0xff]  }
  0x42   :  { %167 = vmatprep.subr.bf16.mxu1 %v1430_v3  ;;  %v1433_v8 = vld [vmem:[#allocation5 + $0x28] ss:$16 sps:$4 sm:$0xff]   ;;  %v1438_v9 = vld [vmem:[#allocation5 + $0xc] ss:$16 sps:$4 sm:$0xff]   ;;  %661 = vmatprep.subr.bf16.mxu0 %v1439_v7  ;;  %v1444_v10 = vld [vmem:[#allocation7 + $0xe0] ss:$16 sps:$4 sm:$0xff]  }
  0x43   :  { %v1445_v11 = vld [vmem:[#allocation7 + $0xc4] ss:$16 sps:$4 sm:$0xff]   ;;  %v1436_v12 = vld [vmem:[#allocation5 + $0x8] ss:$16 sps:$4 sm:$0xff]   ;;  %662 = vmatpush1.bf16.msra.mxu0 %v1444_v10  ;;  %v1450_v13 = vld [vmem:[#allocation7 + $0xc0] ss:$16 sps:$4 sm:$0xff]  }
  0x44   :  { %v1451_v14 = vld [vmem:[#allocation7 + $0xa4] ss:$16 sps:$4 sm:$0xff]   ;;  %v1443_v15 = vld [vmem:[#allocation7 + $0xec] ss:$16 sps:$4 sm:$0xff]   ;;  %663 = vmatprep.subr.bf16.mxu0 %v1445_v11  ;;  %v1456_v16 = vld [vmem:[#allocation7 + $0xa0] ss:$16 sps:$4 sm:$0xff]  }
  0x45   :  { %168 = vmatpush1.bf16.msra.mxu1 %v1432_v4  ;;  %v1441_v17 = vld [vmem:[#allocation7 + $0xe8] ss:$16 sps:$4 sm:$0xff]   ;;  %v1457_v18 = vld [vmem:[#allocation7 + $0x84] ss:$16 sps:$4 sm:$0xff]   ;;  %v1449_v19 = vld [vmem:[#allocation7 + $0xcc] ss:$16 sps:$4 sm:$0xff]  }
  0x46   :  { %206 = vmatprep.subr.bf16.mxu1 %v1435_v5  ;;  %v1447_v20 = vld [vmem:[#allocation7 + $0xc8] ss:$16 sps:$4 sm:$0xff]   ;;  %v1462_v21 = vld [vmem:[#allocation7 + $0x80] ss:$16 sps:$4 sm:$0xff]   ;;  %v1463_v22 = vld [vmem:[#allocation7 + $0x64] ss:$16 sps:$4 sm:$0xff]  }
  0x47   :  { %664 = vmatpush1.bf16.msra.mxu0 %v1450_v13  ;;  %v1455_v23 = vld [vmem:[#allocation7 + $0xac] ss:$16 sps:$4 sm:$0xff]   ;;  %v1468_v24 = vld [vmem:[#allocation7 + $0x60] ss:$16 sps:$4 sm:$0xff]   ;;  %v1453_v25 = vld [vmem:[#allocation7 + $0xa8] ss:$16 sps:$4 sm:$0xff]  }
  0x48   :  { %1233 = vmatmul.mubr.msk.bf16.vlgmr.msra.gmra.mxu1 %vm149_vm0, %v100_v6  ;;  %665 = vmatprep.subr.bf16.mxu0 %v1451_v14  ;;  %v1469_v26 = vld [vmem:[#allocation7 + $0x44] ss:$16 sps:$4 sm:$0xff]   ;;  %v1461_v27 = vld [vmem:[#allocation7 + $0x8c] ss:$16 sps:$4 sm:$0xff]   ;;  %v1459_v28 = vld [vmem:[#allocation7 + $0x88] ss:$16 sps:$4 sm:$0xff]  }
  0x49   :  { %207 = vmatpush1.bf16.msra.mxu1 %v1433_v8  ;;  %226 = vmatprep.mubr.bf16.mxu1 %v1712_v0  ;;  %v1474_v29 = vld [vmem:[#allocation7 + $0x40] ss:$16 sps:$4 sm:$0xff]   ;;  %v1475_v30 = vld [vmem:[#allocation7 + $0x24] ss:$16 sps:$4 sm:$0xff]   ;;  %v1467_v31 = vld [vmem:[#allocation7 + $0x6c] ss:$16 sps:$4 sm:$0xff]  }
  0x4a   :  { %208 = vmatprep.subr.bf16.mxu1 %v1438_v9  ;;  %v1480_v32 = vld [vmem:[#allocation7 + $0x20] ss:$16 sps:$4 sm:$0xff]   ;;  %v1465_v33 = vld [vmem:[#allocation7 + $0x68] ss:$16 sps:$4 sm:$0xff]   ;;  %v1481_v34 = vld [vmem:[#allocation7 + $0x4] ss:$16 sps:$4 sm:$0xff]  }
  0x4b   :  { %666 = vmatpush1.bf16.msra.mxu0 %v1456_v16  ;;  %v1473_v35 = vld [vmem:[#allocation7 + $0x4c] ss:$16 sps:$4 sm:$0xff]   ;;  %v1471_v36 = vld [vmem:[#allocation7 + $0x48] ss:$16 sps:$4 sm:$0xff]   ;;  %v1486_v38 = vld [vmem:[#allocation7] ss:$16 sps:$4 sm:$0xff]  }
  0x4c   :  { %667 = vmatprep.subr.bf16.mxu0 %v1457_v18  ;;  %v1479_v37 = vld [vmem:[#allocation7 + $0x2c] ss:$16 sps:$4 sm:$0xff]   ;;  %v1487_v39 = vld [vmem:[#allocation7 + $0x1e4] ss:$16 sps:$4 sm:$0xff]   ;;  %v1492_v40 = vld [vmem:[#allocation7 + $0x1e0] ss:$16 sps:$4 sm:$0xff]  }
  0x4d   :  { %209 = vmatpush1.bf16.msra.mxu1 %v1436_v12  ;;  %v1477_v41 = vld [vmem:[#allocation7 + $0x28] ss:$16 sps:$4 sm:$0xff]   ;;  %v1493_v42 = vld [vmem:[#allocation7 + $0x1c4] ss:$16 sps:$4 sm:$0xff]   ;;  %v1485_v43 = vld [vmem:[#allocation7 + $0xc] ss:$16 sps:$4 sm:$0xff]   ;;  %v239_v12 = vlaneseq }
  0x4e   :  { %702 = vmatprep.subr.bf16.mxu1 %v1443_v15  ;;  %v1498_v44 = vld [vmem:[#allocation7 + $0x1c0] ss:$16 sps:$4 sm:$0xff]   ;;  %v1483_v45 = vld [vmem:[#allocation7 + $0x8] ss:$16 sps:$4 sm:$0xff]   ;;  %v1499_v46 = vld [vmem:[#allocation7 + $0x1a4] ss:$16 sps:$4 sm:$0xff]  }
  0x4f   :  { %668 = vmatpush1.bf16.msra.mxu0 %v1462_v21  ;;  %v1491_v47 = vld [vmem:[#allocation7 + $0x1ec] ss:$16 sps:$4 sm:$0xff]   ;;  %v1504_v48 = vld [vmem:[#allocation7 + $0x1a0] ss:$16 sps:$4 sm:$0xff]   ;;  %v1489_v49 = vld [vmem:[#allocation7 + $0x1e8] ss:$16 sps:$4 sm:$0xff]  }
  0x50   :  { %1234 = vmatmul.mubr.msk.bf16.vlgmr.msra.gmra.mxu1 %vm149_vm0, %v100_v6  ;;  %669 = vmatprep.subr.bf16.mxu0 %v1463_v22  ;;  %v1497_v50 = vld [vmem:[#allocation7 + $0x1cc] ss:$16 sps:$4 sm:$0xff]   ;;  %v1495_v51 = vld [vmem:[#allocation7 + $0x1c8] ss:$16 sps:$4 sm:$0xff]   ;;  %v1505_v54 = vld [vmem:[#allocation7 + $0x184] ss:$16 sps:$4 sm:$0xff]  }
  0x51   :  { %703 = vmatpush1.bf16.msra.mxu1 %v1441_v17  ;;  %v1503_v52 = vld [vmem:[#allocation7 + $0x1ac] ss:$16 sps:$4 sm:$0xff]   ;;  %v1501_v53 = vld [vmem:[#allocation7 + $0x1a8] ss:$16 sps:$4 sm:$0xff]   ;;  %v1510_v57 = vld [vmem:[#allocation7 + $0x180] ss:$16 sps:$4 sm:$0xff]  }
  0x52   :  { %704 = vmatprep.subr.bf16.mxu1 %v1449_v19  ;;  %v1509_v55 = vld [vmem:[#allocation7 + $0x18c] ss:$16 sps:$4 sm:$0xff]   ;;  %v1507_v56 = vld [vmem:[#allocation7 + $0x188] ss:$16 sps:$4 sm:$0xff]   ;;  %v1511_v58 = vld [vmem:[#allocation7 + $0x164] ss:$16 sps:$4 sm:$0xff]  }
  0x53   :  { %670 = vmatpush1.bf16.msra.mxu0 %v1468_v24  ;;  %v1515_v59 = vld [vmem:[#allocation7 + $0x16c] ss:$16 sps:$4 sm:$0xff]   ;;  %v1513_v60 = vld [vmem:[#allocation7 + $0x168] ss:$16 sps:$4 sm:$0xff]   ;;  %v1516_v61 = vld [vmem:[#allocation7 + $0x160] ss:$16 sps:$4 sm:$0xff]  }
  0x54   :  { %671 = vmatprep.subr.bf16.mxu0 %v1469_v26  ;;  %v1517_v62 = vld [vmem:[#allocation7 + $0x144] ss:$16 sps:$4 sm:$0xff]   ;;  %v1521_v63 = vld [vmem:[#allocation7 + $0x14c] ss:$16 sps:$4 sm:$0xff]   ;;  %v1519_v0 = vld [vmem:[#allocation7 + $0x148] ss:$16 sps:$4 sm:$0xff]  }
  0x55   :  { %705 = vmatpush1.bf16.msra.mxu1 %v1447_v20  ;;  %v1522_v1 = vld [vmem:[#allocation7 + $0x140] ss:$16 sps:$4 sm:$0xff]   ;;  %v1523_v2 = vld [vmem:[#allocation7 + $0x124] ss:$16 sps:$4 sm:$0xff]   ;;  %v1527_v3 = vld [vmem:[#allocation7 + $0x12c] ss:$16 sps:$4 sm:$0xff]  }
  0x56   :  { %706 = vmatprep.subr.bf16.mxu1 %v1455_v23  ;;  %v1525_v4 = vld [vmem:[#allocation7 + $0x128] ss:$16 sps:$4 sm:$0xff]   ;;  %v1528_v5 = vld [vmem:[#allocation7 + $0x120] ss:$16 sps:$4 sm:$0xff]   ;;  %v1529_v6 = vld [vmem:[#allocation7 + $0x104] ss:$16 sps:$4 sm:$0xff]  }
  0x57   :  { %672 = vmatpush1.bf16.msra.mxu0 %v1474_v29  ;;  %v1533_v7 = vld [vmem:[#allocation7 + $0x10c] ss:$16 sps:$4 sm:$0xff]   ;;  %v1531_v8 = vld [vmem:[#allocation7 + $0x108] ss:$16 sps:$4 sm:$0xff]   ;;  %v1534_v9 = vld [vmem:[#allocation7 + $0x100] ss:$16 sps:$4 sm:$0xff]  }
  0x58   :  { %673 = vmatprep.subr.bf16.mxu0 %v1475_v30  ;;  %v1535_v10 = vld [vmem:[#allocation8 + $0x78] sm:$0xff]   ;;  %v1795_v13 = vshrl.u32 %v239_v12, 7  ;;  %vm1714_vm1 = vmmov 0   ;;  %s1715_s18 = smov [#allocation11]  }
  0x59   :  { %707 = vmatpush1.bf16.msra.mxu1 %v1453_v25  ;;  %v1536_v11 = vld [vmem:[#allocation8 + $0xf8] sm:$0xff]   ;;  %s1214_s19 = sshll.u32 %s1715_s18, 4  ;;  %s1215_s19 = int_to_ptr.vmem [resolvable:$true] %s1214_s19 }
  0x5a   :  { %708 = vmatprep.subr.bf16.mxu1 %v1461_v27  ;;  %v241_v16 = vsub.s32 0, %v1795_v13  ;;  %v237_v18 = vld [vmem:[%s1826_s2] sm:$0x3]  ;;  %v245_v19 = vsub.s32 1, %v1795_v13  ;;  %p1680_p12 = scmp.lt.s32.totalorder %s1215_s19, %s1215_s19 }
  0x5b   :  { %674 = vmatpush1.bf16.msra.mxu0 %v1480_v32 }
  0x5c   :  { %675 = vmatprep.subr.bf16.mxu0 %v1481_v34  ;;  %v242_v21 = vrot.slane %v237_v18, %v241_v16  ;;  %v246_v24 = vrot.slane %v237_v18, %v245_v19  ;;  %v1537_v34 = vld [vmem:[#allocation8 + $0x38] sm:$0xff]  }
  0x5d   :  { %709 = vmatpush1.bf16.msra.mxu1 %v1459_v28 }
  0x5e   :  { %710 = vmatprep.subr.bf16.mxu1 %v1467_v31 }
  0x5f   :  { %676 = vmatpush1.bf16.msra.mxu0 %v1486_v38  ;;  %v1540_v38 = vld [vmem:[#allocation8 + $0xf0] sm:$0xff]  }
  0x60   :  { %677 = vmatprep.subr.bf16.mxu0 %v1487_v39  ;;  %v1541_v39 = vld [vmem:[#allocation8 + $0x30] sm:$0xff]  }
  0x61   :  { %711 = vmatpush1.bf16.msra.mxu1 %v1465_v33 }
  0x62   :  { %712 = vmatprep.subr.bf16.mxu1 %v1473_v35  ;;  %v1538_v35 = vld [vmem:[#allocation8 + $0xb8] sm:$0xff]  }
  0x63   :  { %678 = vmatpush2.bf16.msra.mxu0 %v1492_v40  ;;  %v1542_v40 = vld [vmem:[#allocation8 + $0xb0] sm:$0xff]  }
  0x64   :  { %679 = vmatprep.subr.bf16.mxu0 %v1493_v42  ;;  %v1544_v42 = vld [vmem:[#allocation8 + $0xe8] sm:$0xff]  }
  0x65   :  { %713 = vmatpush1.bf16.msra.mxu1 %v1471_v36 }
  0x66   :  { %714 = vmatprep.subr.bf16.mxu1 %v1479_v37  ;;  %v1539_v37 = vld [vmem:[#allocation8 + $0x70] sm:$0xff]  }
  0x67   :  { %680 = vmatpush2.bf16.msra.mxu0 %v1498_v44  ;;  %v1546_v44 = vld [vmem:[#allocation8 + $0xa8] sm:$0xff]  }
  0x68   :  { %681 = vmatprep.subr.bf16.mxu0 %v1499_v46  ;;  %v1548_v46 = vld [vmem:[#allocation8 + $0xe0] sm:$0xff]  }
  0x69   :  { %715 = vmatpush1.bf16.msra.mxu1 %v1477_v41  ;;  %v1543_v41 = vld [vmem:[#allocation8 + $0x68] sm:$0xff]  }
  0x6a   :  { %716 = vmatprep.subr.bf16.mxu1 %v1485_v43  ;;  %v1545_v43 = vld [vmem:[#allocation8 + $0x28] sm:$0xff]  }
  0x6b   :  { %682 = vmatpush2.bf16.msra.mxu0 %v1504_v48  ;;  %v1550_v48 = vld [vmem:[#allocation8 + $0xa0] sm:$0xff]  }
  0x6c   :  { %683 = vmatprep.subr.bf16.mxu0 %v1505_v54  ;;  %v1556_v54 = vld [vmem:[#allocation8 + $0xd0] sm:$0xff]  }
  0x6d   :  { %717 = vmatpush1.bf16.msra.mxu1 %v1483_v45  ;;  %v1547_v45 = vld [vmem:[#allocation8 + $0x60] sm:$0xff]  }
  0x6e   :  { %718 = vmatprep.subr.bf16.mxu1 %v1491_v47  ;;  %v1549_v47 = vld [vmem:[#allocation8 + $0x20] sm:$0xff]  }
  0x6f   :  { %684 = vmatpush2.bf16.msra.mxu0 %v1510_v57  ;;  %v1559_v57 = vld [vmem:[#allocation8 + $0x48] sm:$0xff]  }
  0x70   :  { %685 = vmatprep.subr.bf16.mxu0 %v1511_v58  ;;  %v1560_v58 = vld [vmem:[#allocation8 + $0xc8] sm:$0xff]  }
  0x71   :  { %719 = vmatpush2.bf16.msra.mxu1 %v1489_v49  ;;  %v1551_v49 = vld [vmem:[#allocation8 + $0x58] sm:$0xff]  }
  0x72   :  { %720 = vmatprep.subr.bf16.mxu1 %v1497_v50  ;;  %v1552_v50 = vld [vmem:[#allocation8 + $0xd8] sm:$0xff]  }
  0x73   :  { %686 = vmatpush2.bf16.msra.mxu0 %v1516_v61  ;;  %v1563_v61 = vld [vmem:[#allocation8 + $0x40] sm:$0xff]  }
  0x74   :  { %687 = vmatprep.subr.bf16.mxu0 %v1517_v62  ;;  %v1564_v62 = vld [vmem:[#allocation8 + $0xc0] sm:$0xff]  }
  0x75   :  { %721 = vmatpush2.bf16.msra.mxu1 %v1495_v51  ;;  %v1553_v51 = vld [vmem:[#allocation8 + $0x18] sm:$0xff]  }
  0x76   :  { %722 = vmatprep.subr.bf16.mxu1 %v1503_v52  ;;  %v1554_v52 = vld [vmem:[#allocation8 + $0x98] sm:$0xff]  }
  0x77   :  { %688 = vmatpush2.bf16.msra.mxu0 %v1522_v1  ;;  %v1713_v1 = vmov 0.0  }
  0x78   :  { %689 = vmatprep.subr.bf16.mxu0 %v1523_v2  ;;  %v331_v2 = vsub.s32 2, %v1795_v13 }
  0x79   :  { %723 = vmatpush2.bf16.msra.mxu1 %v1501_v53  ;;  %v1555_v53 = vld [vmem:[#allocation8 + $0x50] sm:$0xff]  }
  0x7a   :  { %724 = vmatprep.subr.bf16.mxu1 %v1509_v55  ;;  %v1557_v55 = vld [vmem:[#allocation8 + $0x10] sm:$0xff]  }
  0x7b   :  { %690 = vmatpush2.bf16.msra.mxu0 %v1528_v5 }
  0x7c   :  { %691 = vmatprep.subr.bf16.mxu0 %v1529_v6 }
  0x7d   :  { %725 = vmatpush2.bf16.msra.mxu1 %v1507_v56  ;;  %v1558_v56 = vld [vmem:[#allocation8 + $0x90] sm:$0xff]  }
  0x7e   :  { %726 = vmatprep.subr.bf16.mxu1 %v1515_v59  ;;  %v1561_v59 = vld [vmem:[#allocation8 + $0x8] sm:$0xff]  }
  0x7f   :  { %692 = vmatpush2.bf16.msra.mxu0 %v1534_v9 }
  0x80   :  { %1341 = vmatprep.subr.bf16.mxu0 %v1535_v10 }
  0x81   :  { %727 = vmatpush2.bf16.msra.mxu1 %v1513_v60  ;;  %v1562_v60 = vld [vmem:[#allocation8 + $0x88] sm:$0xff]  }
  0x82   :  { %728 = vmatprep.subr.bf16.mxu1 %v1521_v63  ;;  %v1565_v63 = vld [vmem:[#allocation8] sm:$0xff]  }
  0x85   :  { %729 = vmatpush2.bf16.msra.mxu1 %v1519_v0  ;;  %v1566_v0 = vld [vmem:[#allocation8 + $0x80] sm:$0xff]  }
  0x86   :  { %730 = vmatprep.subr.bf16.mxu1 %v1527_v3  ;;  %v319_v3 = vld [vmem:[%s1828_s4] sm:$0xf] }
  0x87   :  { %v324_v5 = vrot.slane %v319_v3, %v241_v16  ;;  %v332_v6 = vrot.slane %v319_v3, %v331_v2 }
  0x89   :  { %731 = vmatpush2.bf16.msra.mxu1 %v1525_v4  ;;  %v335_v4 = vsub.s32 3, %v1795_v13 }
  0x8a   :  { %732 = vmatprep.subr.bf16.mxu1 %v1533_v7  ;;  %v328_v7 = vrot.slane %v319_v3, %v245_v19  ;;  %v1567_v19 = vld [vmem:[#allocation10 + $0x38] sm:$0xff]  }
  0x8d   :  { %733 = vmatpush2.bf16.msra.mxu1 %v1531_v8  ;;  %v336_v8 = vrot.slane %v319_v3, %v335_v4 }
  0x8e   :  { %1363 = vmatprep.subr.bf16.mxu1 %v1536_v11 }
 0x108   :  { %v187_v14 = vpop.f32.mrf.mxu1 }
 0x10a   :  { %v189_v15 = vpop.f32.mrf.mxu1 }
 0x10c   :  { %v191_v17 = vpop.f32.mrf.mxu1 }
 0x10e   :  { %v192_v20 = vpop.f32.mrf.mxu1 }
 0x110   :  { %v228_v22 = vpop.f32.mrf.mxu1 }
 0x111   :  { %v235_v23 = vmax.f32 %v187_v14, %v228_v22 }
 0x112   :  { %v230_v25 = vpop.f32.mrf.mxu1 }
 0x113   :  { %v249_v26 = vadd.f32 %v242_v21, %v235_v23  ;;  %v236_v27 = vmax.f32 %v189_v15, %v230_v25 }
 0x114   :  { %v232_v28 = vpop.f32.mrf.mxu1 }
 0x115   :  { %v250_v29 = vadd.f32 %v246_v24, %v236_v27  ;;  %v251_v30 = vmax.f32 %v249_v26, 0.0 }
 0x116   :  { %v233_v31 = vpop.f32.mrf.mxu1 }
 0x117   :  { %v252_v32 = vmax.f32 %v250_v29, 0.0  ;;  %v253_v36 = vpack.c.bf16 %v251_v30, %v251_v30  ;;  %v1568_v30 = vld [vmem:[#allocation10 + $0x30] sm:$0xff]   ;;  %v1569_v31 = vld [vmem:[#allocation10 + $0x28] sm:$0xff]  }
 0x119   :  { %v254_v33 = vpack.c.bf16 %v252_v32, %v252_v32  ;;  %v1570_v32 = vld [vmem:[#allocation10 + $0x20] sm:$0xff]  }
 0x11b   :  { %693 = vmatprep.mubr.bf16.mxu0 %v254_v33  ;;  %734 = vmatprep.mubr.bf16.mxu1 %v254_v33  ;;  %v1571_v33 = vld [vmem:[#allocation10 + $0x18] sm:$0xff]  }
 0x11c   :  { %694 = vmatmul.mubr.bf16.vlgmr.msra.gmra.mxu0 %v253_v36  ;;  %735 = vmatmul.mubr.bf16.vlgmr.msra.gmra.mxu1 %v253_v36  ;;  %v1574_v36 = vld [vmem:[#allocation10] sm:$0xff]  }
 0x11d   :  { %1342 = vmatpush3.bf16.msra.mxu0 %v1537_v34  ;;  %1364 = vmatpush3.bf16.msra.mxu1 %v1538_v35  ;;  %v1572_v34 = vld [vmem:[#allocation10 + $0x10] sm:$0xff]   ;;  %v1573_v35 = vld [vmem:[#allocation10 + $0x8] sm:$0xff]  }
 0x11e   :  { %1343 = vmatprep.subr.bf16.mxu0 %v1539_v37  ;;  %1365 = vmatprep.subr.bf16.mxu1 %v1540_v38 }
 0x121   :  { %1344 = vmatpush3.bf16.msra.mxu0 %v1541_v39  ;;  %1366 = vmatpush3.bf16.msra.mxu1 %v1542_v40  ;;  %v1299_v39 = vld [vmem:[%s1830_s6] ss:$0 sm:$0xff]  ;;  %s1675_s6 = scalar_lea.vmem %s1215_s19, 128 }
 0x122   :  { %1345 = vmatprep.subr.bf16.mxu0 %v1543_v41  ;;  %1367 = vmatprep.subr.bf16.mxu1 %v1544_v42  ;;  %p1676_p11 = scmp.ne.s32.totalorder %s1215_s19, %s1675_s6  ;;  %p1681_p13 = scmp.lt.s32.totalorder %s1675_s6, %s1675_s6 }
 0x124   :  { %p1682_p0 = por %p1681_p13, %p1680_p12 }
 0x125   :  { %1346 = vmatpush3.bf16.msra.mxu0 %v1545_v43  ;;  %1368 = vmatpush3.bf16.msra.mxu1 %v1546_v44 }
 0x126   :  { %1347 = vmatprep.subr.bf16.mxu0 %v1547_v45  ;;  %1369 = vmatprep.subr.bf16.mxu1 %v1548_v46  ;;  %p1683_p1 = pnand %p1682_p0, %p1676_p11 }
 0x129   :  { %1348 = vmatpush3.bf16.msra.mxu0 %v1549_v47  ;;  %1370 = vmatpush3.bf16.msra.mxu1 %v1550_v48 }
 0x12a   :  { %1349 = vmatprep.subr.bf16.mxu0 %v1551_v49  ;;  %1371 = vmatprep.subr.bf16.mxu1 %v1552_v50 }
 0x12d   :  { %1350 = vmatpush3.bf16.msra.mxu0 %v1553_v51  ;;  %1372 = vmatpush3.bf16.msra.mxu1 %v1554_v52  ;;  %v1332_v52 = vld [vmem:[%s1832_s8] ss:$0 sm:$0xff] }
 0x12e   :  { %1351 = vmatprep.subr.bf16.mxu0 %v1555_v53  ;;  %1373 = vmatprep.subr.bf16.mxu1 %v1556_v54 }
 0x131   :  { %1352 = vmatpush3.bf16.msra.mxu0 %v1557_v55  ;;  %1374 = vmatpush3.bf16.msra.mxu1 %v1558_v56 }
 0x132   :  { %1353 = vmatprep.subr.bf16.mxu0 %v1559_v57  ;;  %1375 = vmatprep.subr.bf16.mxu1 %v1560_v58 }
 0x135   :  { %1354 = vmatpush3.bf16.msra.mxu0 %v1561_v59  ;;  %1376 = vmatpush3.bf16.msra.mxu1 %v1562_v60 }
 0x136   :  { %1355 = vmatprep.subr.bf16.mxu0 %v1563_v61  ;;  %1377 = vmatprep.subr.bf16.mxu1 %v1564_v62 }
 0x139   :  { %1356 = vmatpush3.bf16.msra.mxu0 %v1565_v63  ;;  %1378 = vmatpush3.bf16.msra.mxu1 %v1566_v0 }
 0x13a   :  { %1394 = vmatprep.subr.bf16.mxu0 %v1713_v1 }
 0x1dc   :  { %v695_v9 = vpop.f32.mrf.mxu0  ;;  %v736_v10 = vpop.f32.mrf.mxu1 }
 0x1dd   :  { %v696_v11 = vadd.f32 %v695_v9, %v324_v5  ;;  %v737_v12 = vadd.f32 %v736_v10, %v332_v6 }
 0x1de   :  { %v697_v14 = vpop.f32.mrf.mxu0  ;;  %v738_v15 = vpop.f32.mrf.mxu1 }
 0x1df   :  { %v698_v17 = vadd.f32 %v697_v14, %v328_v7  ;;  %v739_v18 = vadd.f32 %v738_v15, %v336_v8  ;;  %v743_v20 = vmax.f32 %v696_v11, 0.0  ;;  %v745_v21 = vmax.f32 %v737_v12, 0.0 }
 0x1e0   :  { %v699_v22 = vpop.f32.mrf.mxu0  ;;  %v740_v23 = vpop.f32.mrf.mxu1 }
 0x1e1   :  { %v744_v24 = vmax.f32 %v698_v17, 0.0  ;;  %v746_v25 = vmax.f32 %v739_v18, 0.0  ;;  %v747_v28 = vpack.c.bf16 %v743_v20, %v743_v20  ;;  %v749_v29 = vpack.c.bf16 %v745_v21, %v745_v21 }
 0x1e2   :  { %v700_v16 = vpop.f32.mrf.mxu0  ;;  %v741_v26 = vpop.f32.mrf.mxu1 }
 0x1e3   :  { %v748_v27 = vpack.c.bf16 %v744_v24, %v744_v24  ;;  %v750_v13 = vpack.c.bf16 %v746_v25, %v746_v25 }
 0x1e5   :  { %1046 = vmatprep.mubr.bf16.mxu0 %v748_v27  ;;  %1086 = vmatprep.mubr.bf16.mxu1 %v750_v13 }
 0x1e6   :  { %1047 = vmatmul.mubr.bf16.vlgmr.msra.gmra.mxu0 %v747_v28  ;;  %1087 = vmatmul.mubr.bf16.vlgmr.msra.gmra.mxu1 %v749_v29 }
 0x1e7   :  { %1395 = vmatpush3.bf16.msra.mxu0 %v1567_v19  ;;  %1410 = vmatprep.mubr.msk.bf16.mxu0 %vm1714_vm1, %v1713_v1 }
 0x1e8   :  { %1396 = vmatprep.subr.bf16.mxu0 %v1713_v1 }
 0x1eb   :  { %1397 = vmatpush3.bf16.msra.mxu0 %v1568_v30 }
 0x1ec   :  { %1398 = vmatprep.subr.bf16.mxu0 %v1713_v1 }
 0x1ef   :  { %1399 = vmatpush3.bf16.msra.mxu0 %v1569_v31 }
 0x1f0   :  { %1400 = vmatprep.subr.bf16.mxu0 %v1713_v1 }
 0x1f3   :  { %1401 = vmatpush3.bf16.msra.mxu0 %v1570_v32 }
 0x1f4   :  { %1402 = vmatprep.subr.bf16.mxu0 %v1713_v1 }
 0x1f7   :  { %1403 = vmatpush3.bf16.msra.mxu0 %v1571_v33 }
 0x1f8   :  { %1404 = vmatprep.subr.bf16.mxu0 %v1713_v1 }
 0x1fb   :  { %1405 = vmatpush3.bf16.msra.mxu0 %v1572_v34 }
 0x1fc   :  { %1406 = vmatprep.subr.bf16.mxu0 %v1713_v1 }
 0x1ff   :  { %1407 = vmatpush3.bf16.msra.mxu0 %v1573_v35 }
 0x200   :  { %1408 = vmatprep.subr.bf16.mxu0 %v1713_v1 }
 0x203   :  { %1409 = vmatpush3.bf16.msra.mxu0 %v1574_v36 }
 0x2a6   :  { %v1357_v37 = vpop.f32.mrf.mxu0  ;;  %v1379_v38 = vpop.f32.mrf.mxu1 }
 0x2a8   :  { %v1358_v40 = vpop.f32.mrf.mxu0  ;;  %v1380_v41 = vpop.f32.mrf.mxu1 }
 0x2a9   :  { %v1359_v42 = vadd.f32 %v1358_v40, %v1357_v37  ;;  %v1381_v46 = vadd.f32 %v1380_v41, %v1379_v38 }
 0x2aa   :  { %v1360_v43 = vpop.f32.mrf.mxu0  ;;  %v1382_v44 = vpop.f32.mrf.mxu1 }
 0x2ab   :  { %v1049_v45 = vadd.f32 %v1359_v42, %v1299_v39 }
 0x2ac   :  { %v1361_v47 = vpop.f32.mrf.mxu0  ;;  %v1383_v48 = vpop.f32.mrf.mxu1 }
 0x2ad   :  { %v1089_v49 = vadd.f32 %v1381_v46, %v1049_v45 }
 0x2af   :  { %v1094_v50 = vmax.f32 %v1089_v49, 0.0 }
 0x2b1   :  { %v1095_v51 = vpack.c.bf16 %v1094_v50, %v1094_v50 }
 0x2b3   :  { %1411 = vmatmul.mubr.bf16.vlgmr.msra.gmra.mxu0 %v1095_v51 }
 0x373   :  { %v1201_v53 = vpop.f32.mrf.mxu0 }
 0x374   :  { %v1202_v54 = vadd.f32 %v1332_v52, %v1201_v53 }
 0x375   :  { %v1412_v55 = vpop.f32.mrf.mxu0 }
 0x376   :  { %1207 = vst [vmem:[#allocation11] sm:$0xff] %v1202_v54 }
 0x377   :  { %v1204_v56 = vpop.f32.mrf.mxu0 }
 0x378   :  { %1686 = shalt.err (!%p1683_p1)
}
 0x379   :  { %1217 = dma.vmem_to_hbm [thread:$0]  %s1215_s19, 128, %s1833_s9, [#allocation4]   ;;  %v1413_v57 = vpop.f32.mrf.mxu0 }
 0x37a   :  { %1701 = dma.done.wait [#allocation4], 128  }
 0x37b   :  { %1702 = vsyncadd [#allocation4], 4294967168 }
 0x37c   :  { %1221 = vsyncpa [#allocation3], 1 }
 0x37d   :  { %1222 = vsyncpa [#allocation6], 1 }
 0x37e   :  { %1223 = vsyncpa [#allocation9], 1 }
 0x37f   :  { %1224 = vsyncpa [#allocation4], 1 }

</bundles_post_ra>
